<compile_context>
chip_gen: v7x
topology: tpu7x:2x2x1
jax: 0.10.0
libtpu: 0.0.40
codegen_flags: <defaults>
</compile_context>

<pallas_src>
import functools
import math

import jax
import jax.numpy as jnp
from jax.experimental import pallas as pl
from jax.experimental.pallas import tpu as pltpu


# ----------------------------- Pallas kernel -------------------------------


def _magnet_fused_kernel(xT_ref, tr_ref, ti_ref,
                         w1r_ref, w1i_ref, b1_ref,
                         w2r_ref, w2i_ref, b2_ref,
                         w3r_ref, w3i_ref, b3_ref,
                         wr_ref, br_ref, out_ref, *, num_cheb):
    """Fused MAGNET forward in feature-major layout.

    xT:   (Fin, N)            node features transposed (real == imag at input)
    tr:   (N, N)  bf16        T_real^T   (propagation:  s @ tr)
    ti:   (N, N)  bf16        T_imag^T
    w?r:  (K+1, 2Fout, C)     combined weights applied to the T_real branch
    w?i:  (K+1, 2Fout, C)     combined weights applied to the T_imag branch
                              (C = Fin for layer 1, 2*Fin otherwise; signs for
                               rr - ii / ir + ri recombination folded in)
    b?:   (2Fout, 1)          bias, stacked [real; imag]
    wr:   (1, 16), br: (1,1)  final Linear (transposed)
    out:  (1, N)              final prediction (lane-dense slab)
    """
    t_r = tr_ref[...]                      # (N, N) bf16, resident once in VMEM
    t_i = ti_ref[...]

    def cheb_layer(h, w_r_ref, w_i_ref, b_ref, relu_real):
        # h: (C, N) f32 state; rows are features (layer>=2: [real; imag]).
        fout2 = w_r_ref.shape[1]
        fout = fout2 // 2
        # k = 0: both operator branches start from h.
        acc = (jnp.dot(w_r_ref[0], h, preferred_element_type=jnp.float32)
               + jnp.dot(w_i_ref[0], h, preferred_element_type=jnp.float32))
        if num_cheb > 1:
            h_b = h.astype(jnp.bfloat16)
            # hop 1: lane-dense (C, N) @ (N, N) per operator branch
            p_r = jnp.dot(h_b, t_r, preferred_element_type=jnp.float32)
            p_i = jnp.dot(h_b, t_i, preferred_element_type=jnp.float32)
            acc = acc + jnp.dot(w_r_ref[1], p_r,
                                preferred_element_type=jnp.float32)
            acc = acc + jnp.dot(w_i_ref[1], p_i,
                                preferred_element_type=jnp.float32)
            pp_r = h
            pp_i = h
            for k in range(2, num_cheb):
                n_r = 2.0 * jnp.dot(p_r.astype(jnp.bfloat16), t_r,
                                    preferred_element_type=jnp.float32) - pp_r
                n_i = 2.0 * jnp.dot(p_i.astype(jnp.bfloat16), t_i,
                                    preferred_element_type=jnp.float32) - pp_i
                acc = acc + jnp.dot(w_r_ref[k], n_r,
                                    preferred_element_type=jnp.float32)
                acc = acc + jnp.dot(w_i_ref[k], n_i,
                                    preferred_element_type=jnp.float32)
                pp_r, pp_i, p_r, p_i = p_r, p_i, n_r, n_i
        acc = acc + b_ref[...]                       # (2Fout, N), [real; imag]
        if relu_real:
            # ReLU on the real half only: sublane row mask, no slicing/concat.
            row = jax.lax.broadcasted_iota(jnp.int32, acc.shape, 0)
            acc = jnp.where(row < fout, jnp.maximum(acc, 0.0), acc)
        return acc

    h = xT_ref[...]                                          # (Fin, N)
    h = cheb_layer(h, w1r_ref, w1i_ref, b1_ref, relu_real=True)
    h = cheb_layer(h, w2r_ref, w2i_ref, b2_ref, relu_real=True)
    h = cheb_layer(h, w3r_ref, w3i_ref, b3_ref, relu_real=False)  # (16, N)
    # Fused Linear(16, 1): (1,16) @ (16,N) -> lane-dense (1, N) store.
    out_ref[...] = (jnp.dot(wr_ref[...], h, preferred_element_type=jnp.float32)
                    + br_ref[...])


# ------------------------------ wrapper -------------------------------------

_VMEM = pl.BlockSpec(memory_space=pltpu.MemorySpace.VMEM)


def _vmem_limit_bytes():
    """Generation-aware VMEM budget: ~85% of physical per-core VMEM."""
    try:
        cap = int(pltpu.get_tpu_info().vmem_capacity_bytes)
    except Exception:
        cap = 64 * 1024 * 1024
    return int(min(cap * 0.85, 110 * 1024 * 1024))


def magnet_fused_forward(x, t_r_T, t_i_T, prepared_params):
    (w1r, w1i, b1), (w2r, w2i, b2), (w3r, w3i, b3), (wr_t, br) = prepared_params
    n = x.shape[0]
    kernel = functools.partial(_magnet_fused_kernel, num_cheb=w1r.shape[0])
    out_t = pl.pallas_call(
        kernel,
        out_shape=jax.ShapeDtypeStruct((1, n), jnp.float32),
        in_specs=[_VMEM] * 14,
        out_specs=_VMEM,
        compiler_params=pltpu.CompilerParams(
            vmem_limit_bytes=_vmem_limit_bytes()),
    )(x.T, t_r_T, t_i_T, w1r, w1i, b1, w2r, w2i, b2, w3r, w3i, b3, wr_t, br)
    return out_t.reshape(n, 1)


# ---------------------- graph / parameter setup (glue) ----------------------


def build_propagation_matrices(edge_index, num_nodes, q):
    """Dense T_real/T_imag = -(D^-1/2 A_sym D^-1/2) (.) exp(i Theta), oriented
    so that propagate(x) = T @ x matches PyG source->target message passing."""
    src, dst = edge_index[0], edge_index[1]
    a = jnp.zeros((num_nodes, num_nodes), jnp.float32).at[src, dst].add(1.0)
    a_sym = 0.5 * (a + a.T)
    theta = 2.0 * math.pi * q * (a - a.T)
    deg = jnp.sum(a_sym, axis=1)
    d_inv_sqrt = jnp.where(deg > 0.0,
                           jax.lax.rsqrt(jnp.maximum(deg, 1e-30)), 0.0)
    dd = d_inv_sqrt[:, None] * d_inv_sqrt[None, :]
    # message on edge (src=j -> tgt=i) uses Theta[j, i]  =>  theta^T
    t_real = -dd * a_sym * jnp.cos(theta.T)
    t_imag = -dd * a_sym * jnp.sin(theta.T)
    return t_real, t_imag


def prepare_graph(edge_index, num_nodes, q=0.25):
    """Hoisted out of the per-forward path: build transposed bf16 operators
    (dd and a_sym are symmetric, so T^T = -dd * a_sym (.) exp(i theta))."""
    t_real, t_imag = build_propagation_matrices(edge_index, num_nodes, q)
    return t_real.T.astype(jnp.bfloat16), t_imag.T.astype(jnp.bfloat16)


def init_params(key, input_features, half_hidden=8, K=2):
    hidden = 2 * half_hidden
    layer_dims = [(input_features, hidden), (hidden, hidden),
                  (hidden, half_hidden)]
    keys = jax.random.split(key, len(layer_dims) + 2)
    convs = []
    for li, (fin, fout) in enumerate(layer_dims):
        limit = math.sqrt(6.0 / (fin + fout))      # glorot uniform, zero bias
        w = jax.random.uniform(keys[li], (K + 1, fin, fout), jnp.float32,
                               -limit, limit)
        b = jnp.zeros((fout,), jnp.float32)
        convs.append((w, b))
    lim = 1.0 / math.sqrt(hidden)                  # Linear(16, 1) default init
    w_r = jax.random.uniform(keys[-2], (hidden, 1), jnp.float32, -lim, lim)
    b_r = jax.random.uniform(keys[-1], (1,), jnp.float32, -lim, lim)
    return convs, (w_r, b_r)


def prepare_params(params):
    """Build sign-folded, transposed combined weights.

    Per Chebyshev order k the kernel computes
        acc += w_r[k] @ s_realop_k  +  w_i[k] @ s_imagop_k
    where acc rows are [out_real^T ; out_imag^T].  The rr - ii / ir + ri
    recombination signs are folded into w_i, so no in-kernel slicing/concats.
    """
    convs, (w_r, b_r) = params
    prepared = []
    for li, (w, b) in enumerate(convs):
        wT = jnp.transpose(w, (0, 2, 1))                     # (K+1, Fout, Fin)
        if li == 0:
            # layer 1: x_real == x_imag, single propagation stream per branch
            w_real = jnp.concatenate([wT, wT], axis=1)       # (K+1, 2Fout, Fin)
            w_imag = jnp.concatenate([-wT, wT], axis=1)
        else:
            z = jnp.zeros_like(wT)
            # real-op branch carries [rr; ri], imag-op branch carries [ir; ii]
            w_real = jnp.concatenate(
                [jnp.concatenate([wT, z], axis=2),
                 jnp.concatenate([z, wT], axis=2)], axis=1)  # (K+1, 2Fout, 2Fin)
            w_imag = jnp.concatenate(
                [jnp.concatenate([z, -wT], axis=2),
                 jnp.concatenate([wT, z], axis=2)], axis=1)
        b_col = jnp.concatenate([b, b]).reshape(-1, 1)       # (2Fout, 1)
        prepared.append((w_real, w_imag, b_col))
    prepared.append((w_r.T, b_r.reshape(1, 1)))              # (1,16), (1,1)
    return tuple(prepared)


@jax.jit
def magnet_forward(prepared_params, data_x, t_r_T, t_i_T):
    return magnet_fused_forward(data_x, t_r_T, t_i_T, prepared_params)


# --------------------------- pure-JAX reference ------------------------------


def _reference_forward(params, x, t_real, t_imag):
    convs, (w_r, b_r) = params

    def conv(xr, xi, w, b, relu_real):
        t0 = [xr, xi, xr, xi]                       # rr, ii, ir, ri streams
        ops = [t_real, t_imag, t_imag, t_real]
        outs = [t @ w[0] for t in t0]
        t1 = [op @ t for op, t in zip(ops, t0)]
        outs = [o + t @ w[1] for o, t in zip(outs, t1)]
        for k in range(2, w.shape[0]):
            t2 = [2.0 * (op @ a) - bprev for op, a, bprev in zip(ops, t1, t0)]
            outs = [o + t @ w[k] for o, t in zip(outs, t2)]
            t0, t1 = t1, t2
        rr, ii, ir, ri = outs
        o_re = rr - ii + b
        o_im = ir + ri + b
        if relu_real:
            o_re = jnp.maximum(o_re, 0.0)
        return o_re, o_im

    xr, xi = x, x
    xr, xi = conv(xr, xi, convs[0][0], convs[0][1], True)
    xr, xi = conv(xr, xi, convs[1][0], convs[1][1], True)
    xr, xi = conv(xr, xi, convs[2][0], convs[2][1], False)
    feat = jnp.concatenate([xr, xi], axis=-1)
    return feat @ w_r + b_r


# --------------------------------- main --------------------------------------

if __name__ == "__main__":
    key = jax.random.PRNGKey(0)
    k_x, k_e, k_p = jax.random.split(key, 3)

    num_nodes = 64
    input_features = 4
    num_edges = 192

    data_x = jax.random.normal(k_x, (num_nodes, input_features), jnp.float32)
    data_edge_index = jax.random.randint(k_e, (2, num_edges), 0, num_nodes,
                                         dtype=jnp.int32)

    params = init_params(k_p, input_features, half_hidden=8, K=2)
    prepared_params = prepare_params(params)

    # Graph preprocessing done once per graph, outside the jitted forward.
    t_r_T, t_i_T = prepare_graph(data_edge_index, num_nodes, q=0.25)

    out = magnet_forward(prepared_params, data_x, t_r_T, t_i_T)
    out = jax.block_until_ready(out)

    assert out.shape == (num_nodes, 1)
    assert bool(jnp.all(jnp.isfinite(out)))

    # Numerical check against the plain-JAX 4-stream f32 reference
    # (tolerance loosened because the kernel uses bf16 propagation operands).
    t_real, t_imag = build_propagation_matrices(data_edge_index, num_nodes,
                                                q=0.25)
    ref = _reference_forward(params, data_x, t_real, t_imag)
    err = float(jnp.max(jnp.abs(out - ref)))
    tol = 3e-2 * (1.0 + float(jnp.max(jnp.abs(ref))))
    assert err < tol, f"max abs err {err} vs tol {tol}"

    print("KERNEL_OK")
</pallas_src>

<mosaic_0001>
module attributes {stable_mosaic.version = 11 : i64} {
  func.func @_magnet_fused_kernel(%arg0: memref<4x64xf32, #tpu.memory_space<vmem>>, %arg1: memref<64x64xbf16, #tpu.memory_space<vmem>>, %arg2: memref<64x64xbf16, #tpu.memory_space<vmem>>, %arg3: memref<3x32x4xf32, #tpu.memory_space<vmem>>, %arg4: memref<3x32x4xf32, #tpu.memory_space<vmem>>, %arg5: memref<32x1xf32, #tpu.memory_space<vmem>>, %arg6: memref<3x32x32xf32, #tpu.memory_space<vmem>>, %arg7: memref<3x32x32xf32, #tpu.memory_space<vmem>>, %arg8: memref<32x1xf32, #tpu.memory_space<vmem>>, %arg9: memref<3x16x32xf32, #tpu.memory_space<vmem>>, %arg10: memref<3x16x32xf32, #tpu.memory_space<vmem>>, %arg11: memref<16x1xf32, #tpu.memory_space<vmem>>, %arg12: memref<1x16xf32, #tpu.memory_space<vmem>>, %arg13: memref<1x1xf32, #tpu.memory_space<vmem>>, %arg14: memref<1x64xf32, #tpu.memory_space<vmem>>) attributes {dimension_semantics = [], scalar_prefetch = 0 : i64, scratch_operands = 0 : i64, tpu.core_type = #tpu.core_type<tc>} {
    %c0 = arith.constant 0 : index
    %c0_0 = arith.constant 0 : index
    %0 = vector.load %arg1[%c0, %c0_0] : memref<64x64xbf16, #tpu.memory_space<vmem>>, vector<64x64xbf16>
    %c0_1 = arith.constant 0 : index
    %c0_2 = arith.constant 0 : index
    %1 = vector.load %arg2[%c0_1, %c0_2] : memref<64x64xbf16, #tpu.memory_space<vmem>>, vector<64x64xbf16>
    %c0_3 = arith.constant 0 : index
    %c0_4 = arith.constant 0 : index
    %2 = vector.load %arg0[%c0_3, %c0_4] : memref<4x64xf32, #tpu.memory_space<vmem>>, vector<4x64xf32>
    %c0_5 = arith.constant 0 : index
    %c0_6 = arith.constant 0 : index
    %c0_7 = arith.constant 0 : index
    %3 = vector.load %arg3[%c0_5, %c0_6, %c0_7] : memref<3x32x4xf32, #tpu.memory_space<vmem>>, vector<1x32x4xf32>
    %4 = vector.shape_cast %3 : vector<1x32x4xf32> to vector<32x4xf32>
    %cst = arith.constant dense<0.000000e+00> : vector<32x64xf32>
    %5 = tpu.matmul %4, %2, %cst {dimension_numbers = #tpu.dot_dimension_numbers<[1], [0], [0], [1], [0, 0, 1, 1], [], []>} : vector<32x4xf32>, vector<4x64xf32>, vector<32x64xf32> -> vector<32x64xf32>
    %c0_8 = arith.constant 0 : index
    %c0_9 = arith.constant 0 : index
    %c0_10 = arith.constant 0 : index
    %6 = vector.load %arg4[%c0_8, %c0_9, %c0_10] : memref<3x32x4xf32, #tpu.memory_space<vmem>>, vector<1x32x4xf32>
    %7 = vector.shape_cast %6 : vector<1x32x4xf32> to vector<32x4xf32>
    %cst_11 = arith.constant dense<0.000000e+00> : vector<32x64xf32>
    %8 = tpu.matmul %7, %2, %cst_11 {dimension_numbers = #tpu.dot_dimension_numbers<[1], [0], [0], [1], [0, 0, 1, 1], [], []>} : vector<32x4xf32>, vector<4x64xf32>, vector<32x64xf32> -> vector<32x64xf32>
    %9 = arith.addf %5, %8 : vector<32x64xf32>
    %10 = arith.truncf %2 : vector<4x64xf32> to vector<4x64xbf16>
    %cst_12 = arith.constant dense<0.000000e+00> : vector<4x64xf32>
    %11 = tpu.matmul %10, %0, %cst_12 {dimension_numbers = #tpu.dot_dimension_numbers<[1], [0], [0], [1], [0, 0, 1, 1], [], []>} : vector<4x64xbf16>, vector<64x64xbf16>, vector<4x64xf32> -> vector<4x64xf32>
    %cst_13 = arith.constant dense<0.000000e+00> : vector<4x64xf32>
    %12 = tpu.matmul %10, %1, %cst_13 {dimension_numbers = #tpu.dot_dimension_numbers<[1], [0], [0], [1], [0, 0, 1, 1], [], []>} : vector<4x64xbf16>, vector<64x64xbf16>, vector<4x64xf32> -> vector<4x64xf32>
    %c1 = arith.constant 1 : index
    %c0_14 = arith.constant 0 : index
    %c0_15 = arith.constant 0 : index
    %13 = vector.load %arg3[%c1, %c0_14, %c0_15] : memref<3x32x4xf32, #tpu.memory_space<vmem>>, vector<1x32x4xf32>
    %14 = vector.shape_cast %13 : vector<1x32x4xf32> to vector<32x4xf32>
    %cst_16 = arith.constant dense<0.000000e+00> : vector<32x64xf32>
    %15 = tpu.matmul %14, %11, %cst_16 {dimension_numbers = #tpu.dot_dimension_numbers<[1], [0], [0], [1], [0, 0, 1, 1], [], []>} : vector<32x4xf32>, vector<4x64xf32>, vector<32x64xf32> -> vector<32x64xf32>
    %16 = arith.addf %9, %15 : vector<32x64xf32>
    %c1_17 = arith.constant 1 : index
    %c0_18 = arith.constant 0 : index
    %c0_19 = arith.constant 0 : index
    %17 = vector.load %arg4[%c1_17, %c0_18, %c0_19] : memref<3x32x4xf32, #tpu.memory_space<vmem>>, vector<1x32x4xf32>
    %18 = vector.shape_cast %17 : vector<1x32x4xf32> to vector<32x4xf32>
    %cst_20 = arith.constant dense<0.000000e+00> : vector<32x64xf32>
    %19 = tpu.matmul %18, %12, %cst_20 {dimension_numbers = #tpu.dot_dimension_numbers<[1], [0], [0], [1], [0, 0, 1, 1], [], []>} : vector<32x4xf32>, vector<4x64xf32>, vector<32x64xf32> -> vector<32x64xf32>
    %20 = arith.addf %16, %19 : vector<32x64xf32>
    %21 = arith.truncf %11 : vector<4x64xf32> to vector<4x64xbf16>
    %cst_21 = arith.constant dense<0.000000e+00> : vector<4x64xf32>
    %22 = tpu.matmul %21, %0, %cst_21 {dimension_numbers = #tpu.dot_dimension_numbers<[1], [0], [0], [1], [0, 0, 1, 1], [], []>} : vector<4x64xbf16>, vector<64x64xbf16>, vector<4x64xf32> -> vector<4x64xf32>
    %cst_22 = arith.constant 2.000000e+00 : f32
    %23 = vector.broadcast %cst_22 : f32 to vector<4x64xf32>
    %24 = arith.mulf %23, %22 : vector<4x64xf32>
    %25 = arith.subf %24, %2 : vector<4x64xf32>
    %26 = arith.truncf %12 : vector<4x64xf32> to vector<4x64xbf16>
    %cst_23 = arith.constant dense<0.000000e+00> : vector<4x64xf32>
    %27 = tpu.matmul %26, %1, %cst_23 {dimension_numbers = #tpu.dot_dimension_numbers<[1], [0], [0], [1], [0, 0, 1, 1], [], []>} : vector<4x64xbf16>, vector<64x64xbf16>, vector<4x64xf32> -> vector<4x64xf32>
    %cst_24 = arith.constant 2.000000e+00 : f32
    %28 = vector.broadcast %cst_24 : f32 to vector<4x64xf32>
    %29 = arith.mulf %28, %27 : vector<4x64xf32>
    %30 = arith.subf %29, %2 : vector<4x64xf32>
    %c2 = arith.constant 2 : index
    %c0_25 = arith.constant 0 : index
    %c0_26 = arith.constant 0 : index
    %31 = vector.load %arg3[%c2, %c0_25, %c0_26] : memref<3x32x4xf32, #tpu.memory_space<vmem>>, vector<1x32x4xf32>
    %32 = vector.shape_cast %31 : vector<1x32x4xf32> to vector<32x4xf32>
    %cst_27 = arith.constant dense<0.000000e+00> : vector<32x64xf32>
    %33 = tpu.matmul %32, %25, %cst_27 {dimension_numbers = #tpu.dot_dimension_numbers<[1], [0], [0], [1], [0, 0, 1, 1], [], []>} : vector<32x4xf32>, vector<4x64xf32>, vector<32x64xf32> -> vector<32x64xf32>
    %34 = arith.addf %20, %33 : vector<32x64xf32>
    %c2_28 = arith.constant 2 : index
    %c0_29 = arith.constant 0 : index
    %c0_30 = arith.constant 0 : index
    %35 = vector.load %arg4[%c2_28, %c0_29, %c0_30] : memref<3x32x4xf32, #tpu.memory_space<vmem>>, vector<1x32x4xf32>
    %36 = vector.shape_cast %35 : vector<1x32x4xf32> to vector<32x4xf32>
    %cst_31 = arith.constant dense<0.000000e+00> : vector<32x64xf32>
    %37 = tpu.matmul %36, %30, %cst_31 {dimension_numbers = #tpu.dot_dimension_numbers<[1], [0], [0], [1], [0, 0, 1, 1], [], []>} : vector<32x4xf32>, vector<4x64xf32>, vector<32x64xf32> -> vector<32x64xf32>
    %38 = arith.addf %34, %37 : vector<32x64xf32>
    %c0_32 = arith.constant 0 : index
    %c0_33 = arith.constant 0 : index
    %39 = vector.load %arg5[%c0_32, %c0_33] : memref<32x1xf32, #tpu.memory_space<vmem>>, vector<32x1xf32>
    %40 = vector.broadcast %39 : vector<32x1xf32> to vector<32x64xf32>
    %41 = arith.addf %38, %40 : vector<32x64xf32>
    %42 = tpu.iota {dimensions = array<i32: 0>} : vector<32x64xi32>
    %c16_i32 = arith.constant 16 : i32
    %43 = vector.broadcast %c16_i32 : i32 to vector<32x64xi32>
    %44 = arith.cmpi slt, %42, %43 : vector<32x64xi32>
    %cst_34 = arith.constant 0.000000e+00 : f32
    %45 = vector.broadcast %cst_34 : f32 to vector<32x64xf32>
    %46 = arith.maximumf %41, %45 : vector<32x64xf32>
    %47 = arith.select %44, %46, %41 : vector<32x64xi1>, vector<32x64xf32>
    %c0_35 = arith.constant 0 : index
    %c0_36 = arith.constant 0 : index
    %c0_37 = arith.constant 0 : index
    %48 = vector.load %arg6[%c0_35, %c0_36, %c0_37] : memref<3x32x32xf32, #tpu.memory_space<vmem>>, vector<1x32x32xf32>
    %49 = vector.shape_cast %48 : vector<1x32x32xf32> to vector<32x32xf32>
    %cst_38 = arith.constant dense<0.000000e+00> : vector<32x64xf32>
    %50 = tpu.matmul %49, %47, %cst_38 {dimension_numbers = #tpu.dot_dimension_numbers<[1], [0], [0], [1], [0, 0, 1, 1], [], []>} : vector<32x32xf32>, vector<32x64xf32>, vector<32x64xf32> -> vector<32x64xf32>
    %c0_39 = arith.constant 0 : index
    %c0_40 = arith.constant 0 : index
    %c0_41 = arith.constant 0 : index
    %51 = vector.load %arg7[%c0_39, %c0_40, %c0_41] : memref<3x32x32xf32, #tpu.memory_space<vmem>>, vector<1x32x32xf32>
    %52 = vector.shape_cast %51 : vector<1x32x32xf32> to vector<32x32xf32>
    %cst_42 = arith.constant dense<0.000000e+00> : vector<32x64xf32>
    %53 = tpu.matmul %52, %47, %cst_42 {dimension_numbers = #tpu.dot_dimension_numbers<[1], [0], [0], [1], [0, 0, 1, 1], [], []>} : vector<32x32xf32>, vector<32x64xf32>, vector<32x64xf32> -> vector<32x64xf32>
    %54 = arith.addf %50, %53 : vector<32x64xf32>
    %55 = arith.truncf %47 : vector<32x64xf32> to vector<32x64xbf16>
    %cst_43 = arith.constant dense<0.000000e+00> : vector<32x64xf32>
    %56 = tpu.matmul %55, %0, %cst_43 {dimension_numbers = #tpu.dot_dimension_numbers<[1], [0], [0], [1], [0, 0, 1, 1], [], []>} : vector<32x64xbf16>, vector<64x64xbf16>, vector<32x64xf32> -> vector<32x64xf32>
    %cst_44 = arith.constant dense<0.000000e+00> : vector<32x64xf32>
    %57 = tpu.matmul %55, %1, %cst_44 {dimension_numbers = #tpu.dot_dimension_numbers<[1], [0], [0], [1], [0, 0, 1, 1], [], []>} : vector<32x64xbf16>, vector<64x64xbf16>, vector<32x64xf32> -> vector<32x64xf32>
    %c1_45 = arith.constant 1 : index
    %c0_46 = arith.constant 0 : index
    %c0_47 = arith.constant 0 : index
    %58 = vector.load %arg6[%c1_45, %c0_46, %c0_47] : memref<3x32x32xf32, #tpu.memory_space<vmem>>, vector<1x32x32xf32>
    %59 = vector.shape_cast %58 : vector<1x32x32xf32> to vector<32x32xf32>
    %cst_48 = arith.constant dense<0.000000e+00> : vector<32x64xf32>
    %60 = tpu.matmul %59, %56, %cst_48 {dimension_numbers = #tpu.dot_dimension_numbers<[1], [0], [0], [1], [0, 0, 1, 1], [], []>} : vector<32x32xf32>, vector<32x64xf32>, vector<32x64xf32> -> vector<32x64xf32>
    %61 = arith.addf %54, %60 : vector<32x64xf32>
    %c1_49 = arith.constant 1 : index
    %c0_50 = arith.constant 0 : index
    %c0_51 = arith.constant 0 : index
    %62 = vector.load %arg7[%c1_49, %c0_50, %c0_51] : memref<3x32x32xf32, #tpu.memory_space<vmem>>, vector<1x32x32xf32>
    %63 = vector.shape_cast %62 : vector<1x32x32xf32> to vector<32x32xf32>
    %cst_52 = arith.constant dense<0.000000e+00> : vector<32x64xf32>
    %64 = tpu.matmul %63, %57, %cst_52 {dimension_numbers = #tpu.dot_dimension_numbers<[1], [0], [0], [1], [0, 0, 1, 1], [], []>} : vector<32x32xf32>, vector<32x64xf32>, vector<32x64xf32> -> vector<32x64xf32>
    %65 = arith.addf %61, %64 : vector<32x64xf32>
    %66 = arith.truncf %56 : vector<32x64xf32> to vector<32x64xbf16>
    %cst_53 = arith.constant dense<0.000000e+00> : vector<32x64xf32>
    %67 = tpu.matmul %66, %0, %cst_53 {dimension_numbers = #tpu.dot_dimension_numbers<[1], [0], [0], [1], [0, 0, 1, 1], [], []>} : vector<32x64xbf16>, vector<64x64xbf16>, vector<32x64xf32> -> vector<32x64xf32>
    %cst_54 = arith.constant 2.000000e+00 : f32
    %68 = vector.broadcast %cst_54 : f32 to vector<32x64xf32>
    %69 = arith.mulf %68, %67 : vector<32x64xf32>
    %70 = arith.subf %69, %47 : vector<32x64xf32>
    %71 = arith.truncf %57 : vector<32x64xf32> to vector<32x64xbf16>
    %cst_55 = arith.constant dense<0.000000e+00> : vector<32x64xf32>
    %72 = tpu.matmul %71, %1, %cst_55 {dimension_numbers = #tpu.dot_dimension_numbers<[1], [0], [0], [1], [0, 0, 1, 1], [], []>} : vector<32x64xbf16>, vector<64x64xbf16>, vector<32x64xf32> -> vector<32x64xf32>
    %cst_56 = arith.constant 2.000000e+00 : f32
    %73 = vector.broadcast %cst_56 : f32 to vector<32x64xf32>
    %74 = arith.mulf %73, %72 : vector<32x64xf32>
    %75 = arith.subf %74, %47 : vector<32x64xf32>
    %c2_57 = arith.constant 2 : index
    %c0_58 = arith.constant 0 : index
    %c0_59 = arith.constant 0 : index
    %76 = vector.load %arg6[%c2_57, %c0_58, %c0_59] : memref<3x32x32xf32, #tpu.memory_space<vmem>>, vector<1x32x32xf32>
    %77 = vector.shape_cast %76 : vector<1x32x32xf32> to vector<32x32xf32>
    %cst_60 = arith.constant dense<0.000000e+00> : vector<32x64xf32>
    %78 = tpu.matmul %77, %70, %cst_60 {dimension_numbers = #tpu.dot_dimension_numbers<[1], [0], [0], [1], [0, 0, 1, 1], [], []>} : vector<32x32xf32>, vector<32x64xf32>, vector<32x64xf32> -> vector<32x64xf32>
    %79 = arith.addf %65, %78 : vector<32x64xf32>
    %c2_61 = arith.constant 2 : index
    %c0_62 = arith.constant 0 : index
    %c0_63 = arith.constant 0 : index
    %80 = vector.load %arg7[%c2_61, %c0_62, %c0_63] : memref<3x32x32xf32, #tpu.memory_space<vmem>>, vector<1x32x32xf32>
    %81 = vector.shape_cast %80 : vector<1x32x32xf32> to vector<32x32xf32>
    %cst_64 = arith.constant dense<0.000000e+00> : vector<32x64xf32>
    %82 = tpu.matmul %81, %75, %cst_64 {dimension_numbers = #tpu.dot_dimension_numbers<[1], [0], [0], [1], [0, 0, 1, 1], [], []>} : vector<32x32xf32>, vector<32x64xf32>, vector<32x64xf32> -> vector<32x64xf32>
    %83 = arith.addf %79, %82 : vector<32x64xf32>
    %c0_65 = arith.constant 0 : index
    %c0_66 = arith.constant 0 : index
    %84 = vector.load %arg8[%c0_65, %c0_66] : memref<32x1xf32, #tpu.memory_space<vmem>>, vector<32x1xf32>
    %85 = vector.broadcast %84 : vector<32x1xf32> to vector<32x64xf32>
    %86 = arith.addf %83, %85 : vector<32x64xf32>
    %87 = tpu.iota {dimensions = array<i32: 0>} : vector<32x64xi32>
    %c16_i32_67 = arith.constant 16 : i32
    %88 = vector.broadcast %c16_i32_67 : i32 to vector<32x64xi32>
    %89 = arith.cmpi slt, %87, %88 : vector<32x64xi32>
    %cst_68 = arith.constant 0.000000e+00 : f32
    %90 = vector.broadcast %cst_68 : f32 to vector<32x64xf32>
    %91 = arith.maximumf %86, %90 : vector<32x64xf32>
    %92 = arith.select %89, %91, %86 : vector<32x64xi1>, vector<32x64xf32>
    %c0_69 = arith.constant 0 : index
    %c0_70 = arith.constant 0 : index
    %c0_71 = arith.constant 0 : index
    %93 = vector.load %arg9[%c0_69, %c0_70, %c0_71] : memref<3x16x32xf32, #tpu.memory_space<vmem>>, vector<1x16x32xf32>
    %94 = vector.shape_cast %93 : vector<1x16x32xf32> to vector<16x32xf32>
    %cst_72 = arith.constant dense<0.000000e+00> : vector<16x64xf32>
    %95 = tpu.matmul %94, %92, %cst_72 {dimension_numbers = #tpu.dot_dimension_numbers<[1], [0], [0], [1], [0, 0, 1, 1], [], []>} : vector<16x32xf32>, vector<32x64xf32>, vector<16x64xf32> -> vector<16x64xf32>
    %c0_73 = arith.constant 0 : index
    %c0_74 = arith.constant 0 : index
    %c0_75 = arith.constant 0 : index
    %96 = vector.load %arg10[%c0_73, %c0_74, %c0_75] : memref<3x16x32xf32, #tpu.memory_space<vmem>>, vector<1x16x32xf32>
    %97 = vector.shape_cast %96 : vector<1x16x32xf32> to vector<16x32xf32>
    %cst_76 = arith.constant dense<0.000000e+00> : vector<16x64xf32>
    %98 = tpu.matmul %97, %92, %cst_76 {dimension_numbers = #tpu.dot_dimension_numbers<[1], [0], [0], [1], [0, 0, 1, 1], [], []>} : vector<16x32xf32>, vector<32x64xf32>, vector<16x64xf32> -> vector<16x64xf32>
    %99 = arith.addf %95, %98 : vector<16x64xf32>
    %100 = arith.truncf %92 : vector<32x64xf32> to vector<32x64xbf16>
    %cst_77 = arith.constant dense<0.000000e+00> : vector<32x64xf32>
    %101 = tpu.matmul %100, %0, %cst_77 {dimension_numbers = #tpu.dot_dimension_numbers<[1], [0], [0], [1], [0, 0, 1, 1], [], []>} : vector<32x64xbf16>, vector<64x64xbf16>, vector<32x64xf32> -> vector<32x64xf32>
    %cst_78 = arith.constant dense<0.000000e+00> : vector<32x64xf32>
    %102 = tpu.matmul %100, %1, %cst_78 {dimension_numbers = #tpu.dot_dimension_numbers<[1], [0], [0], [1], [0, 0, 1, 1], [], []>} : vector<32x64xbf16>, vector<64x64xbf16>, vector<32x64xf32> -> vector<32x64xf32>
    %c1_79 = arith.constant 1 : index
    %c0_80 = arith.constant 0 : index
    %c0_81 = arith.constant 0 : index
    %103 = vector.load %arg9[%c1_79, %c0_80, %c0_81] : memref<3x16x32xf32, #tpu.memory_space<vmem>>, vector<1x16x32xf32>
    %104 = vector.shape_cast %103 : vector<1x16x32xf32> to vector<16x32xf32>
    %cst_82 = arith.constant dense<0.000000e+00> : vector<16x64xf32>
    %105 = tpu.matmul %104, %101, %cst_82 {dimension_numbers = #tpu.dot_dimension_numbers<[1], [0], [0], [1], [0, 0, 1, 1], [], []>} : vector<16x32xf32>, vector<32x64xf32>, vector<16x64xf32> -> vector<16x64xf32>
    %106 = arith.addf %99, %105 : vector<16x64xf32>
    %c1_83 = arith.constant 1 : index
    %c0_84 = arith.constant 0 : index
    %c0_85 = arith.constant 0 : index
    %107 = vector.load %arg10[%c1_83, %c0_84, %c0_85] : memref<3x16x32xf32, #tpu.memory_space<vmem>>, vector<1x16x32xf32>
    %108 = vector.shape_cast %107 : vector<1x16x32xf32> to vector<16x32xf32>
    %cst_86 = arith.constant dense<0.000000e+00> : vector<16x64xf32>
    %109 = tpu.matmul %108, %102, %cst_86 {dimension_numbers = #tpu.dot_dimension_numbers<[1], [0], [0], [1], [0, 0, 1, 1], [], []>} : vector<16x32xf32>, vector<32x64xf32>, vector<16x64xf32> -> vector<16x64xf32>
    %110 = arith.addf %106, %109 : vector<16x64xf32>
    %111 = arith.truncf %101 : vector<32x64xf32> to vector<32x64xbf16>
    %cst_87 = arith.constant dense<0.000000e+00> : vector<32x64xf32>
    %112 = tpu.matmul %111, %0, %cst_87 {dimension_numbers = #tpu.dot_dimension_numbers<[1], [0], [0], [1], [0, 0, 1, 1], [], []>} : vector<32x64xbf16>, vector<64x64xbf16>, vector<32x64xf32> -> vector<32x64xf32>
    %cst_88 = arith.constant 2.000000e+00 : f32
    %113 = vector.broadcast %cst_88 : f32 to vector<32x64xf32>
    %114 = arith.mulf %113, %112 : vector<32x64xf32>
    %115 = arith.subf %114, %92 : vector<32x64xf32>
    %116 = arith.truncf %102 : vector<32x64xf32> to vector<32x64xbf16>
    %cst_89 = arith.constant dense<0.000000e+00> : vector<32x64xf32>
    %117 = tpu.matmul %116, %1, %cst_89 {dimension_numbers = #tpu.dot_dimension_numbers<[1], [0], [0], [1], [0, 0, 1, 1], [], []>} : vector<32x64xbf16>, vector<64x64xbf16>, vector<32x64xf32> -> vector<32x64xf32>
    %cst_90 = arith.constant 2.000000e+00 : f32
    %118 = vector.broadcast %cst_90 : f32 to vector<32x64xf32>
    %119 = arith.mulf %118, %117 : vector<32x64xf32>
    %120 = arith.subf %119, %92 : vector<32x64xf32>
    %c2_91 = arith.constant 2 : index
    %c0_92 = arith.constant 0 : index
    %c0_93 = arith.constant 0 : index
    %121 = vector.load %arg9[%c2_91, %c0_92, %c0_93] : memref<3x16x32xf32, #tpu.memory_space<vmem>>, vector<1x16x32xf32>
    %122 = vector.shape_cast %121 : vector<1x16x32xf32> to vector<16x32xf32>
    %cst_94 = arith.constant dense<0.000000e+00> : vector<16x64xf32>
    %123 = tpu.matmul %122, %115, %cst_94 {dimension_numbers = #tpu.dot_dimension_numbers<[1], [0], [0], [1], [0, 0, 1, 1], [], []>} : vector<16x32xf32>, vector<32x64xf32>, vector<16x64xf32> -> vector<16x64xf32>
    %124 = arith.addf %110, %123 : vector<16x64xf32>
    %c2_95 = arith.constant 2 : index
    %c0_96 = arith.constant 0 : index
    %c0_97 = arith.constant 0 : index
    %125 = vector.load %arg10[%c2_95, %c0_96, %c0_97] : memref<3x16x32xf32, #tpu.memory_space<vmem>>, vector<1x16x32xf32>
    %126 = vector.shape_cast %125 : vector<1x16x32xf32> to vector<16x32xf32>
    %cst_98 = arith.constant dense<0.000000e+00> : vector<16x64xf32>
    %127 = tpu.matmul %126, %120, %cst_98 {dimension_numbers = #tpu.dot_dimension_numbers<[1], [0], [0], [1], [0, 0, 1, 1], [], []>} : vector<16x32xf32>, vector<32x64xf32>, vector<16x64xf32> -> vector<16x64xf32>
    %128 = arith.addf %124, %127 : vector<16x64xf32>
    %c0_99 = arith.constant 0 : index
    %c0_100 = arith.constant 0 : index
    %129 = vector.load %arg11[%c0_99, %c0_100] : memref<16x1xf32, #tpu.memory_space<vmem>>, vector<16x1xf32>
    %130 = vector.broadcast %129 : vector<16x1xf32> to vector<16x64xf32>
    %131 = arith.addf %128, %130 : vector<16x64xf32>
    %c0_101 = arith.constant 0 : index
    %c0_102 = arith.constant 0 : index
    %132 = vector.load %arg12[%c0_101, %c0_102] : memref<1x16xf32, #tpu.memory_space<vmem>>, vector<1x16xf32>
    %cst_103 = arith.constant dense<0.000000e+00> : vector<1x64xf32>
    %133 = tpu.matmul %132, %131, %cst_103 {dimension_numbers = #tpu.dot_dimension_numbers<[1], [0], [0], [1], [0, 0, 1, 1], [], []>} : vector<1x16xf32>, vector<16x64xf32>, vector<1x64xf32> -> vector<1x64xf32>
    %c0_104 = arith.constant 0 : index
    %c0_105 = arith.constant 0 : index
    %134 = vector.load %arg13[%c0_104, %c0_105] : memref<1x1xf32, #tpu.memory_space<vmem>>, vector<1x1xf32>
    %135 = vector.broadcast %134 : vector<1x1xf32> to vector<1x64xf32>
    %136 = arith.addf %133, %135 : vector<1x64xf32>
    %c0_106 = arith.constant 0 : index
    %c0_107 = arith.constant 0 : index
    %137 = vector.load %arg14[%c0_106, %c0_107] : memref<1x64xf32, #tpu.memory_space<vmem>>, vector<1x64xf32>
    tpu.vector_store %arg14[%c0_106, %c0_107], %136 {strides = array<i32>} : memref<1x64xf32, #tpu.memory_space<vmem>>, vector<1x64xf32>,
    return
  }
}

</mosaic_0001>

<bundles_post_ra>
// kernel: magnet_forward.1
= control target key start
LH: loop header
LB: loop body
LE: loop exit
PB: predicated region body
PF: predicated region fallthrough
CT: control target
= control target key end

     0   :  { %s4242_s0 = inlined_call_operand.vmem [shape: f32[4,64], index: 0, kind: input, shape index: {}]   ;;  %s4243_s1 = inlined_call_operand.vmem [shape: bf16[64,64], index: 1, kind: input, shape index: {}]   ;;  %s4244_s2 = inlined_call_operand.hbm [shape: bf16[64,64], index: 2, kind: input, shape index: {}]   ;;  %s4245_s3 = inlined_call_operand.vmem [shape: f32[3,32,4], index: 3, kind: input, shape index: {}]   ;;  %s4246_s4 = inlined_call_operand.vmem [shape: f32[3,32,4], index: 4, kind: input, shape index: {}]   ;;  %s4247_s5 = inlined_call_operand.vmem [shape: f32[32,1], index: 5, kind: input, shape index: {}]   ;;  %s4248_s6 = inlined_call_operand.vmem [shape: f32[3,32,32], index: 6, kind: input, shape index: {}]   ;;  %s4249_s7 = inlined_call_operand.vmem [shape: f32[3,32,32], index: 7, kind: input, shape index: {}]   ;;  %s4250_s8 = inlined_call_operand.vmem [shape: f32[32,1], index: 8, kind: input, shape index: {}]   ;;  %s4251_s9 = inlined_call_operand.vmem [shape: f32[3,16,32], index: 9, kind: input, shape index: {}]   ;;  %s4252_s10 = inlined_call_operand.vmem [shape: f32[3,16,32], index: 10, kind: input, shape index: {}]   ;;  %s4253_s11 = inlined_call_operand.vmem [shape: f32[16,1], index: 11, kind: input, shape index: {}]   ;;  %s4254_s12 = inlined_call_operand.vmem [shape: f32[1,16], index: 12, kind: input, shape index: {}]   ;;  %s4255_s13 = inlined_call_operand.<no memory space> [shape: f32[1,1], index: 13, kind: input, shape index: {}]   ;;  %s4256_s14 = inlined_call_operand.hbm [shape: f32[1,64], index: 14, kind: output, shape index: {}]  }
   0x1   :  { %v19_v0 = vstv %s4255_s13 }
   0x2   :  { %20 = vst [vmem:[#allocation2] sm:$0x1] %v19_v0 }
   0x3   :  { %21 = vsyncpa [#allocation4], 0 }
   0x4   :  { %22 = vsyncpa [#allocation5], 0  ;;  %s3640_s15 = smov [#allocation3]   ;;  %s3592_s19 = scalar_lea.hbm %s4244_s2, 512 }
   0x5   :  { %s32_s16 = sshll.u32 %s3640_s15, 4  ;;  %p3593_p0 = scmp.ne.s32.totalorder %s4244_s2, %s3592_s19  ;;  %s33_s16 = int_to_ptr.vmem [resolvable:$true] %s32_s16 }
   0x6   :  { %p3596_p1 = scmp.lt.u32.totalorder %s3592_s19, %s4244_s2 }
   0x8   :  { %p3598_p2 = pnand %p3596_p1, %p3593_p0 }
   0xa   :  { %3601 = shalt.err (!%p3598_p2)
}
   0xb   :  { %s3602_s13 = scalar_lea.vmem %s33_s16, 512  ;;  %p3607_p4 = scmp.lt.s32.totalorder %s33_s16, %s33_s16 }
   0xc   :  { %p3603_p3 = scmp.ne.s32.totalorder %s33_s16, %s3602_s13  ;;  %p3608_p5 = scmp.lt.s32.totalorder %s3602_s13, %s3602_s13 }
   0xe   :  { %p3609_p6 = por %p3608_p5, %p3607_p4 }
  0x10   :  { %p3610_p7 = pnand %p3609_p6, %p3603_p3 }
  0x12   :  { %3613 = shalt.err (!%p3610_p7)
}
  0x13   :  { %s3641_s24 = smov 64   ;;  %s3642_s25 = smov 4  }
  0x14   :  { %38 = dma.hbm_to_vmem [thread:$0]  %s4244_s2, 512, %s33_s16, [#allocation4], %s3641_s24, %s3641_s24, %s3642_s25  }
  0x15   :  { %3636 = dma.done.wait [#allocation4], 512  }
  0x16   :  { %3637 = vsyncadd [#allocation4], 4294966784  ;;  %v3643_v1 = vmov 0.0   ;;  %vm3644_vm0 = vmmov 0   ;;  %vm103_vm1 = vcmask 1043456   ;;  %v3744_v2 = vld [vmem:[%s4243_s1] sm:$0xff]  }
  0x17   :  { %3092 = vmatprep.subr.bf16.mxu1 %v3643_v1  ;;  %3100 = vmatprep.mubr.msk.bf16.mxu1 %vm3644_vm0, %v3643_v1  ;;  %vm90_vm2 = vcmask 31744   ;;  %v3749_v3 = vld [vmem:[%s4242_s0] sm:$0xf]  ;;  %v87_v5 = vld [vmem:[%s4246_s4 + $0x8] sm:$0xff]  ;;  %v88_v7 = vld [vmem:[%s4246_s4 + $0x10] sm:$0xff]  ;;  %vm314_vm3 = vcmask 523264  }
  0x18   :  { %v86_v4 = vld [vmem:[%s4246_s4] sm:$0xff]  ;;  %3093 = vmatpush3.bf16.msra.mxu1 %v3744_v2  ;;  %3076 = vmatprep.subr.msk.mxu0 %vm103_vm1, %v3749_v3  ;;  %v3763_v6 = vld [vmem:[%s4243_s1 + $0x8] sm:$0xff]   ;;  %v89_v8 = vld [vmem:[%s4246_s4 + $0x18] sm:$0xff]  ;;  %v289_v15 = vpack.c.bf16 %v3749_v3, %v3749_v3  ;;  %v3645_v40 = vmov 0   ;;  %vm1003_vm4 = vcmask 261120   ;;  %vm2665_vm5 = vcmask 130048  }
  0x19   :  { %3077 = vmatpush3.msk.msra.mxu0 %vm103_vm1, %v3749_v3  ;;  %3078 = vmatprep.mubr.msk.f32.mxu0 %vm90_vm2, %v86_v4  ;;  %v3780_v9 = vld [vmem:[%s4243_s1 + $0x10] sm:$0xff]   ;;  %v82_v10 = vld [vmem:[%s4245_s3] sm:$0xff]  ;;  %v83_v11 = vld [vmem:[%s4245_s3 + $0x8] sm:$0xff]  ;;  %vm2739_vm6 = vcmask 516096  }
  0x1a   :  { %3094 = vmatprep.subr.bf16.mxu1 %v3643_v1  ;;  %3079 = vmatmul.mubr.msk.f32.vlgmr.msra.gmra.mrb[0].mxu0 %vm90_vm2, %v87_v5  ;;  %v3800_v12 = vld [vmem:[%s4243_s1 + $0x18] sm:$0xff]   ;;  %v3802_v13 = vld [vmem:[#allocation3] sm:$0xff]   ;;  %v84_v14 = vld [vmem:[%s4245_s3 + $0x10] sm:$0xff] }
  0x1b   :  { %3081 = vmatprep.mubr.msk.f32.mxu0 %vm90_vm2, %v88_v7  ;;  %3084 = vmatprep.subr.msk.mxu0 %vm103_vm1, %v3749_v3  ;;  %v3813_v16 = vld [vmem:[#allocation3 + $0x8] sm:$0xff]   ;;  %v85_v17 = vld [vmem:[%s4245_s3 + $0x18] sm:$0xff]  ;;  %v2776_v20 = vld [vmem:[%s4245_s3 + $0x20] sm:$0xff] }
  0x1c   :  { %3095 = vmatpush3.bf16.msra.mxu1 %v3763_v6  ;;  %3085 = vmatpush3.msk.msra.mxu0 %vm103_vm1, %v3749_v3  ;;  %v3825_v18 = vld [vmem:[#allocation3 + $0x10] sm:$0xff]   ;;  %v3835_v19 = vld [vmem:[#allocation3 + $0x18] sm:$0xff]   ;;  %v2777_v22 = vld [vmem:[%s4245_s3 + $0x28] sm:$0xff] }
  0x1d   :  { %3096 = vmatprep.subr.bf16.mxu1 %v3643_v1  ;;  %3104 = vmatprep.subr.bf16.mxu0 %v3643_v1  ;;  %v2778_v32 = vld [vmem:[%s4245_s3 + $0x30] sm:$0xff]  ;;  %v2779_v33 = vld [vmem:[%s4245_s3 + $0x38] sm:$0xff]  ;;  %v2785_v34 = vld [vmem:[%s4246_s4 + $0x20] sm:$0xff] }
  0x1e   :  { %3082 = vmatmul.mubr.msk.f32.gmra.mrb[2].mxu0 %vm90_vm2, %v89_v8  ;;  %v2786_v35 = vld [vmem:[%s4246_s4 + $0x28] sm:$0xff]  ;;  %v2787_v36 = vld [vmem:[%s4246_s4 + $0x30] sm:$0xff]  ;;  %v2788_v37 = vld [vmem:[%s4246_s4 + $0x38] sm:$0xff]  ;;  %3582 = vset.pattern.permute.xlu0 %v3645_v40 }
  0x1f   :  { %3086 = vmatprep.mubr.msk.f32.mxu0 %vm90_vm2, %v82_v10  ;;  %v2796_v38 = vld [vmem:[%s4245_s3 + $0x40] sm:$0xff]  ;;  %3583 = vset.pattern.permute.xlu1 %v3645_v40  ;;  %v952_v41 = vld [vmem:[%s4247_s5 + $0x10] sm:$0xff]  ;;  %v951_v42 = vld [vmem:[%s4247_s5 + $0x8] sm:$0xff] }
  0x20   :  { %3097 = vmatpush3.bf16.msra.mxu1 %v3780_v9  ;;  %v950_v39 = vld [vmem:[%s4247_s5] sm:$0xff]  ;;  %966 = vperm.xlu1 %3583, %v952_v41   ;;  %v953_v43 = vld [vmem:[%s4247_s5 + $0x18] sm:$0xff]  ;;  %v1859_v45 = vld [vmem:[%s4250_s8 + $0x8] sm:$0xff] }
  0x21   :  { %3098 = vmatprep.subr.bf16.mxu1 %v3643_v1  ;;  %956 = vperm.xlu0 %3582, %v950_v39   ;;  %v1858_v44 = vld [vmem:[%s4250_s8] sm:$0xff]  ;;  %v1860_v46 = vld [vmem:[%s4250_s8 + $0x10] sm:$0xff]  ;;  %v1861_v47 = vld [vmem:[%s4250_s8 + $0x18] sm:$0xff] }
  0x22   :  { %3087 = vmatmul.mubr.msk.f32.vlgmr.msra.gmra.mrb[0].mxu0 %vm90_vm2, %v83_v11  ;;  %v2640_v48 = vld [vmem:[%s4253_s11] sm:$0xff]  ;;  %v2641_v49 = vld [vmem:[%s4253_s11 + $0x8] sm:$0xff]  ;;  %v2798_v58 = vld [vmem:[%s4245_s3 + $0x50] sm:$0xff] }
  0x23   :  { %3105 = vmatpush3.bf16.msra.mxu0 %v3802_v13  ;;  %3089 = vmatprep.mubr.msk.f32.mxu0 %vm90_vm2, %v84_v14  ;;  %v2655_v50 = vld [vmem:[#allocation2] sm:$0x1]  ;;  %v2797_v57 = vld [vmem:[%s4245_s3 + $0x48] sm:$0xff]  ;;  %v2799_v59 = vld [vmem:[%s4245_s3 + $0x58] sm:$0xff] }
  0x24   :  { %3099 = vmatpush3.bf16.msra.mxu1 %v3800_v12  ;;  %3106 = vmatprep.subr.bf16.mxu0 %v3643_v1  ;;  %v2805_v60 = vld [vmem:[%s4246_s4 + $0x40] sm:$0xff]  ;;  %v2806_v7 = vld [vmem:[%s4246_s4 + $0x48] sm:$0xff]  ;;  %v2807_v8 = vld [vmem:[%s4246_s4 + $0x50] sm:$0xff] }
  0x25   :  { %3132 = vmatprep.subr.bf16.mxu1 %v3643_v1  ;;  %961 = vperm.xlu0 %3582, %v951_v42   ;;  %v999_v10 = vld [vmem:[%s4249_s7] sm:$0xff] }
  0x26   :  { %3090 = vmatmul.mubr.msk.f32.gmra.mrb[2].mxu0 %vm90_vm2, %v85_v17  ;;  %971 = vperm.xlu1 %3583, %v953_v43   ;;  %v2826_v39 = vld [vmem:[%s4248_s6 + $0x20] sm:$0xff] }
  0x27   :  { %3101 = vmatmul.mubr.msk.bf16.vlgmr.msra.gmra.mrb[0].mxu1 %vm314_vm3, %v289_v15  ;;  %3107 = vmatpush3.bf16.msra.mxu0 %v3813_v16 }
  0x28   :  { %3108 = vmatprep.subr.bf16.mxu0 %v3643_v1  ;;  %3112 = vmatprep.mubr.msk.bf16.mxu0 %vm3644_vm0, %v3643_v1 }
  0x29   :  { %3133 = vmatpush3.bf16.msra.mxu1 %v3744_v2  ;;  %3140 = vmatprep.mubr.msk.bf16.mxu1 %vm3644_vm0, %v3643_v1 }
  0x2a   :  { %3134 = vmatprep.subr.bf16.mxu1 %v3643_v1  ;;  %1864 = vperm.xlu0 %3582, %v1858_v44  }
  0x2b   :  { %3109 = vmatpush3.bf16.msra.mxu0 %v3825_v18  ;;  %1869 = vperm.xlu1 %3583, %v1859_v45  }
  0x2c   :  { %3110 = vmatprep.subr.bf16.mxu0 %v3643_v1 }
  0x2d   :  { %3135 = vmatpush3.bf16.msra.mxu1 %v3763_v6 }
  0x2e   :  { %3136 = vmatprep.subr.bf16.mxu1 %v3643_v1  ;;  %1874 = vperm.xlu0 %3582, %v1860_v46   ;;  %v2827_v46 = vld [vmem:[%s4248_s6 + $0x28] sm:$0xff] }
  0x2f   :  { %3111 = vmatpush3.bf16.msra.mxu0 %v3835_v19  ;;  %1879 = vperm.xlu1 %3583, %v1861_v47  }
  0x31   :  { %3137 = vmatpush3.bf16.msra.mxu1 %v3780_v9 }
  0x32   :  { %3113 = vmatmul.mubr.msk.bf16.vlgmr.msra.gmra.mrb[4].mxu0 %vm314_vm3, %v289_v15  ;;  %3138 = vmatprep.subr.bf16.mxu1 %v3643_v1 }
  0x33   :  { %3118 = vmatprep.mubr.msk.f32.mxu0 %vm90_vm2, %v2776_v20  ;;  %2644 = vperm.xlu0 %3582, %v2640_v48  }
  0x34   :  { %2649 = vperm.xlu1 %3583, %v2641_v49  }
  0x35   :  { %3139 = vmatpush3.bf16.msra.mxu1 %v3800_v12 }
  0x36   :  { %3144 = vmatprep.subr.bf16.mxu1 %v3643_v1 }
  0x37   :  { %2658 = vperm.xlu0 %3582, %v2655_v50  }
  0x9f   :  { %v967_v14 = vpop.permute.xlu1 %966 }
  0xa0   :  { %v957_v11 = vpop.permute.xlu0 %956 }
  0xa4   :  { %v962_v15 = vpop.permute.xlu0 %961 }
  0xfa   :  { %v352_v21 = vpop.f32.mrb[0].mxu1 }
  0xfb   :  { %v640_v23 = vpack.c.bf16 %v352_v21, %v352_v21  ;;  %v3102_v24 = vpop.f32.mrb[1].mxu1  ;;  %3116 = vmatprep.subr.msk.mxu0 %vm103_vm1, %v352_v21 }
  0xfc   :  { %v355_v25 = vpop.f32.mrb[2].mxu1  ;;  %3117 = vmatpush3.msk.msra.mxu0 %vm103_vm1, %v352_v21  ;;  %v972_v24 = vpop.permute.xlu1 %971 }
  0xfd   :  { %v3103_v26 = vpop.f32.mrb[3].mxu1  ;;  %3141 = vmatmul.mubr.msk.bf16.vlgmr.msra.gmra.mrb[4].mxu1 %vm314_vm3, %v640_v23  ;;  %3119 = vmatmul.mubr.msk.f32.vlgmr.msra.gmra.mrb[0].mxu0 %vm90_vm2, %v2777_v22 }
  0xfe   :  { %3145 = vmatpush3.bf16.msra.mxu1 %v3802_v13  ;;  %3152 = vmatprep.mubr.msk.bf16.mxu1 %vm3644_vm0, %v3643_v1 }
  0xff   :  { %3146 = vmatprep.subr.bf16.mxu1 %v3643_v1  ;;  %3121 = vmatprep.mubr.msk.f32.mxu0 %vm90_vm2, %v2778_v32  ;;  %v1000_v32 = vld [vmem:[%s4249_s7 + $0x8] sm:$0xff] }
 0x101   :  { %3122 = vmatmul.mubr.msk.f32.gmra.mrb[2].mxu0 %vm90_vm2, %v2779_v33  ;;  %v1001_v33 = vld [vmem:[%s4249_s7 + $0x10] sm:$0xff] }
 0x102   :  { %3147 = vmatpush3.bf16.msra.mxu1 %v3813_v16  ;;  %3126 = vmatprep.mubr.msk.f32.mxu0 %vm90_vm2, %v2785_v34  ;;  %v1002_v34 = vld [vmem:[%s4249_s7 + $0x18] sm:$0xff] }
 0x103   :  { %3148 = vmatprep.subr.bf16.mxu1 %v3643_v1 }
 0x105   :  { %v416_v27 = vpop.f32.mrb[4].mxu0 }
 0x106   :  { %3149 = vmatpush3.bf16.msra.mxu1 %v3825_v18  ;;  %v3114_v28 = vpop.f32.mrb[5].mxu0  ;;  %3124 = vmatprep.subr.msk.mxu0 %vm103_vm1, %v416_v27  ;;  %v686_v31 = vpack.c.bf16 %v416_v27, %v416_v27 }
 0x107   :  { %v419_v29 = vpop.f32.mrb[6].mxu0  ;;  %3150 = vmatprep.subr.bf16.mxu1 %v3643_v1  ;;  %3125 = vmatpush3.msk.msra.mxu0 %vm103_vm1, %v416_v27 }
 0x108   :  { %v3115_v30 = vpop.f32.mrb[7].mxu0  ;;  %3127 = vmatmul.mubr.msk.f32.vlgmr.msra.gmra.mrb[0].mxu0 %vm90_vm2, %v2786_v35  ;;  %v995_v35 = vld [vmem:[%s4248_s6] sm:$0xff] }
 0x109   :  { %3129 = vmatprep.mubr.msk.f32.mxu0 %vm90_vm2, %v2787_v36  ;;  %v996_v36 = vld [vmem:[%s4248_s6 + $0x8] sm:$0xff] }
 0x10a   :  { %3151 = vmatpush3.bf16.msra.mxu1 %v3835_v19 }
 0x10c   :  { %3130 = vmatmul.mubr.msk.f32.gmra.mrb[2].mxu0 %vm90_vm2, %v2788_v37  ;;  %v997_v37 = vld [vmem:[%s4248_s6 + $0x10] sm:$0xff] }
 0x10d   :  { %3153 = vmatmul.mubr.msk.bf16.vlgmr.msra.gmra.mrb[8].mxu1 %vm314_vm3, %v686_v31  ;;  %3158 = vmatprep.mubr.msk.f32.mxu0 %vm90_vm2, %v2796_v38  ;;  %v998_v38 = vld [vmem:[%s4248_s6 + $0x18] sm:$0xff] }
 0x10e   :  { %3180 = vmatprep.mubr.msk.f32.mxu1 %vm1003_vm4, %v999_v10 }
 0x1d0   :  { %v678_v51 = vpop.f32.mrb[4].mxu1 }
 0x1d1   :  { %v684_v52 = vmul.f32 2.0, %v678_v51  ;;  %v3142_v53 = vpop.f32.mrb[5].mxu1 }
 0x1d2   :  { %v681_v54 = vpop.f32.mrb[6].mxu1  ;;  %v2828_v53 = vld [vmem:[%s4248_s6 + $0x30] sm:$0xff] }
 0x1d3   :  { %v685_v55 = vsub.f32 %v684_v52, %v3749_v3  ;;  %v3143_v56 = vpop.f32.mrb[7].mxu1  ;;  %v2829_v54 = vld [vmem:[%s4248_s6 + $0x38] sm:$0xff] }
 0x1d4   :  { %v2835_v56 = vld [vmem:[%s4249_s7 + $0x28] sm:$0xff] }
 0x1d5   :  { %3156 = vmatprep.subr.msk.mxu0 %vm103_vm1, %v685_v55 }
 0x1d6   :  { %3157 = vmatpush3.msk.msra.mxu0 %vm103_vm1, %v685_v55  ;;  %v2834_v55 = vld [vmem:[%s4249_s7 + $0x20] sm:$0xff] }
 0x1d7   :  { %3159 = vmatmul.mubr.msk.f32.vlgmr.msra.gmra.mrb[0].mxu0 %vm90_vm2, %v2797_v57  ;;  %v2836_v57 = vld [vmem:[%s4249_s7 + $0x30] sm:$0xff] }
 0x1d8   :  { %3161 = vmatprep.mubr.msk.f32.mxu0 %vm90_vm2, %v2798_v58  ;;  %v2837_v58 = vld [vmem:[%s4249_s7 + $0x38] sm:$0xff] }
 0x1db   :  { %3162 = vmatmul.mubr.msk.f32.gmra.mrb[2].mxu0 %vm90_vm2, %v2799_v59  ;;  %v2846_v59 = vld [vmem:[%s4248_s6 + $0x40] sm:$0xff] }
 0x1dc   :  { %3166 = vmatprep.mubr.msk.f32.mxu0 %vm90_vm2, %v2805_v60 }
 0x1e0   :  { %v724_v61 = vpop.f32.mrb[8].mxu1 }
 0x1e1   :  { %v730_v62 = vmul.f32 2.0, %v724_v61  ;;  %v3154_v63 = vpop.f32.mrb[9].mxu1 }
 0x1e2   :  { %v727_v0 = vpop.f32.mrb[10].mxu1 }
 0x1e3   :  { %v731_v4 = vsub.f32 %v730_v62, %v3749_v3  ;;  %v3155_v5 = vpop.f32.mrb[11].mxu1  ;;  %v2808_v3 = vld [vmem:[%s4246_s4 + $0x58] sm:$0xff] }
 0x1e5   :  { %3164 = vmatprep.subr.msk.mxu0 %vm103_vm1, %v731_v4 }
 0x1e6   :  { %3165 = vmatpush3.msk.msra.mxu0 %vm103_vm1, %v731_v4 }
 0x1e7   :  { %3167 = vmatmul.mubr.msk.f32.vlgmr.msra.gmra.mrb[0].mxu0 %vm90_vm2, %v2806_v7  ;;  %3200 = vmatprep.subr.bf16.mxu0 %v3744_v2 }
 0x1e8   :  { %3169 = vmatprep.mubr.msk.f32.mxu0 %vm90_vm2, %v2807_v8  ;;  %3201 = vmatpush3.bf16.msra.mxu0 %v3744_v2 }
 0x1e9   :  { %3202 = vmatprep.subr.bf16.mxu0 %v3763_v6 }
 0x1eb   :  { %3170 = vmatmul.mubr.msk.f32.gmra.mrb[2].mxu0 %vm90_vm2, %v2808_v3 }
 0x1ec   :  { %3203 = vmatpush3.bf16.msra.mxu0 %v3763_v6 }
 0x1ed   :  { %3204 = vmatprep.subr.bf16.mxu0 %v3780_v9 }
 0x1f0   :  { %3205 = vmatpush3.bf16.msra.mxu0 %v3780_v9 }
 0x1f1   :  { %3206 = vmatprep.subr.bf16.mxu0 %v3800_v12 }
 0x1f4   :  { %3207 = vmatpush3.bf16.msra.mxu0 %v3800_v12 }
 0x1f5   :  { %3252 = vmatprep.subr.bf16.mxu0 %v3744_v2 }
 0x2ba   :  { %v3168_v17 = vpop.f32.mrb[0].mxu0 }
 0x2bb   :  { %v975_v20 = vadd.f32 %v3168_v17, %v962_v15  ;;  %v927_v21 = vpop.f32.mrb[1].mxu0  ;;  %v2847_v17 = vld [vmem:[%s4248_s6 + $0x48] sm:$0xff] }
 0x2bc   :  { %v974_v22 = vadd.f32 %v957_v11, %v927_v21  ;;  %v2849_v21 = vld [vmem:[%s4248_s6 + $0x58] sm:$0xff] }
 0x2bd   :  { %v3974_v23 = vmax.f32 %v975_v20, 0.0  ;;  %v2848_v20 = vld [vmem:[%s4248_s6 + $0x50] sm:$0xff] }
 0x2be   :  { %v3976_v25 = vmax.f32 %v974_v22, 0.0  ;;  %v3171_v26 = vpop.f32.mrb[2].mxu0  ;;  %v2854_v22 = vld [vmem:[%s4249_s7 + $0x40] sm:$0xff] }
 0x2bf   :  { %v3978_v27 = vadd.f32 %v3171_v26, %v972_v24  ;;  %v937_v28 = vpop.f32.mrb[3].mxu0 }
 0x2c0   :  { %v3425_v29 = vpack.c.bf16 %v3974_v23, %v3976_v25  ;;  %v3982_v30 = vadd.f32 %v967_v14, %v937_v28 }
 0x2c2   :  { %v3429_v31 = vpack.c.bf16 %v3978_v27, %v3982_v30  ;;  %3426 = vmatprep.subr.bf16.mxu1 %v3425_v29  ;;  %3208 = vmatprep.mubr.msk.bf16.mxu0 %vm314_vm3, %v3425_v29 }
 0x2c3   :  { %3428 = vmatpush3.bf16.msra.mxu1 %v3425_v29 }
 0x2c4   :  { %3430 = vmatprep.subr.bf16.mxu1 %v3429_v31  ;;  %3209 = vmatmul.mubr.msk.bf16.vlgmr.msra.gmra.mrb[8].mxu0 %vm314_vm3, %v3429_v31 }
 0x2c5   :  { %3253 = vmatpush3.bf16.msra.mxu0 %v3744_v2 }
 0x2c6   :  { %3254 = vmatprep.subr.bf16.mxu0 %v3763_v6 }
 0x2c7   :  { %3432 = vmatpush3.bf16.msra.mxu1 %v3429_v31 }
 0x2c8   :  { %3434 = vmatprep.subr.bf16.mxu1 %v3425_v29 }
 0x2c9   :  { %3255 = vmatpush3.bf16.msra.mxu0 %v3763_v6 }
 0x2ca   :  { %3181 = vmatmul.mubr.msk.f32.vlgmr.msra.gmra.mrb[12].mxu1 %vm1003_vm4, %v1000_v32  ;;  %3256 = vmatprep.subr.bf16.mxu0 %v3780_v9 }
 0x2cb   :  { %3436 = vmatpush3.bf16.msra.mxu1 %v3425_v29  ;;  %3183 = vmatprep.mubr.msk.f32.mxu1 %vm1003_vm4, %v1001_v33 }
 0x2cc   :  { %3438 = vmatprep.subr.bf16.mxu1 %v3429_v31 }
 0x2cd   :  { %3257 = vmatpush3.bf16.msra.mxu0 %v3780_v9 }
 0x2ce   :  { %3184 = vmatmul.mubr.msk.f32.gmra.mrb[14].mxu1 %vm1003_vm4, %v1002_v34  ;;  %3258 = vmatprep.subr.bf16.mxu0 %v3800_v12 }
 0x2cf   :  { %3440 = vmatpush3.bf16.msra.mxu1 %v3429_v31  ;;  %3194 = vmatprep.mubr.msk.f32.mxu1 %vm1003_vm4, %v995_v35 }
 0x2d0   :  { %3212 = vmatprep.subr.bf16.mxu1 %v3802_v13 }
 0x2d1   :  { %3259 = vmatpush3.bf16.msra.mxu0 %v3800_v12 }
 0x2d2   :  { %3195 = vmatmul.mubr.msk.f32.vlgmr.msra.gmra.mrb[12].mxu1 %vm1003_vm4, %v996_v36  ;;  %3264 = vmatprep.subr.bf16.mxu0 %v3802_v13 }
 0x2d3   :  { %3213 = vmatpush3.bf16.msra.mxu1 %v3802_v13  ;;  %3197 = vmatprep.mubr.msk.f32.mxu1 %vm1003_vm4, %v997_v37 }
 0x2d4   :  { %3214 = vmatprep.subr.bf16.mxu1 %v3813_v16 }
 0x2d6   :  { %3198 = vmatmul.mubr.msk.f32.gmra.mrb[14].mxu1 %vm1003_vm4, %v998_v38 }
 0x2d7   :  { %3215 = vmatpush3.bf16.msra.mxu1 %v3813_v16  ;;  %3220 = vmatprep.mubr.msk.bf16.mxu1 %vm314_vm3, %v3425_v29 }
 0x2d8   :  { %3216 = vmatprep.subr.bf16.mxu1 %v3825_v18 }
 0x2db   :  { %3217 = vmatpush3.bf16.msra.mxu1 %v3825_v18 }
 0x2dc   :  { %3218 = vmatprep.subr.bf16.mxu1 %v3835_v19 }
 0x2df   :  { %3219 = vmatpush3.bf16.msra.mxu1 %v3835_v19 }
 0x2e2   :  { %3221 = vmatmul.mubr.msk.bf16.vlgmr.msra.gmra.mrb[16].mxu1 %vm314_vm3, %v3429_v31 }
 0x2e3   :  { %3232 = vmatprep.mubr.msk.f32.mxu1 %vm1003_vm4, %v2826_v39 }
 0x397   :  { %v3210_v40 = vpop.f32.mrb[8].mxu0 }
 0x398   :  { %v1240_v41 = vpop.f32.mrb[9].mxu0 }
 0x399   :  { %v3211_v42 = vpop.f32.mrb[10].mxu0 }
 0x39a   :  { %v3445_v43 = vpack.c.bf16 %v3211_v42, %v3210_v40  ;;  %v1243_v44 = vpop.f32.mrb[11].mxu0  ;;  %v1865_v42 = vpop.permute.xlu0 %1864 }
 0x39b   :  { %v3441_v45 = vpack.c.bf16 %v1243_v44, %v1240_v41  ;;  %v2855_v41 = vld [vmem:[%s4249_s7 + $0x48] sm:$0xff] }
 0x39d   :  { %3442 = vmatprep.subr.bf16.mxu1 %v3441_v45  ;;  %3260 = vmatprep.mubr.msk.bf16.mxu0 %vm314_vm3, %v3441_v45 }
 0x39e   :  { %3444 = vmatpush3.bf16.msra.mxu1 %v3441_v45  ;;  %3261 = vmatmul.mubr.msk.bf16.vlgmr.msra.gmra.mrb[12].mxu0 %vm314_vm3, %v3445_v43 }
 0x39f   :  { %3446 = vmatprep.subr.bf16.mxu1 %v3445_v43  ;;  %3265 = vmatpush3.bf16.msra.mxu0 %v3802_v13 }
 0x3a0   :  { %3266 = vmatprep.subr.bf16.mxu0 %v3813_v16 }
 0x3a2   :  { %3448 = vmatpush3.bf16.msra.mxu1 %v3445_v43 }
 0x3a3   :  { %3267 = vmatpush3.bf16.msra.mxu0 %v3813_v16 }
 0x3a4   :  { %3268 = vmatprep.subr.bf16.mxu0 %v3825_v18 }
 0x3a5   :  { %3233 = vmatmul.mubr.msk.f32.vlgmr.msra.gmra.mrb[12].mxu1 %vm1003_vm4, %v2827_v46 }
 0x3a6   :  { %3235 = vmatprep.mubr.msk.f32.mxu1 %vm1003_vm4, %v2828_v53 }
 0x3a7   :  { %3269 = vmatpush3.bf16.msra.mxu0 %v3825_v18 }
 0x3a8   :  { %3270 = vmatprep.subr.bf16.mxu0 %v3835_v19 }
 0x3a9   :  { %3236 = vmatmul.mubr.msk.f32.gmra.mrb[14].mxu1 %vm1003_vm4, %v2829_v54 }
 0x3aa   :  { %3246 = vmatprep.mubr.msk.f32.mxu1 %vm1003_vm4, %v2834_v55 }
 0x3ab   :  { %3271 = vmatpush3.bf16.msra.mxu0 %v3835_v19 }
 0x3b5   :  { %v3222_v47 = vpop.f32.mrb[16].mxu1 }
 0x3b6   :  { %v1289_v48 = vpop.f32.mrb[17].mxu1 }
 0x3b7   :  { %v3223_v49 = vpop.f32.mrb[18].mxu1 }
 0x3b8   :  { %v3453_v50 = vpack.c.bf16 %v3223_v49, %v3222_v47  ;;  %v1292_v51 = vpop.f32.mrb[19].mxu1 }
 0x3b9   :  { %v3449_v52 = vpack.c.bf16 %v1292_v51, %v1289_v48  ;;  %v1875_v51 = vpop.permute.xlu0 %1874 }
 0x3bb   :  { %3450 = vmatprep.subr.bf16.mxu1 %v3449_v52  ;;  %3272 = vmatprep.mubr.msk.bf16.mxu0 %vm314_vm3, %v3449_v52 }
 0x3bc   :  { %3452 = vmatpush3.bf16.msra.mxu1 %v3449_v52  ;;  %3273 = vmatmul.mubr.msk.bf16.vlgmr.msra.gmra.mrb[16].mxu0 %vm314_vm3, %v3453_v50 }
 0x3bd   :  { %3454 = vmatprep.subr.bf16.mxu1 %v3453_v50 }
 0x3c0   :  { %3456 = vmatpush3.bf16.msra.mxu1 %v3453_v50 }
 0x3c3   :  { %3247 = vmatmul.mubr.msk.f32.vlgmr.msra.gmra.mrb[12].mxu1 %vm1003_vm4, %v2835_v56 }
 0x3c4   :  { %3249 = vmatprep.mubr.msk.f32.mxu1 %vm1003_vm4, %v2836_v57  ;;  %v1897_v57 = vld [vmem:[%s4252_s10 + $0x8] sm:$0xff] }
 0x3c7   :  { %3250 = vmatmul.mubr.msk.f32.gmra.mrb[14].mxu1 %vm1003_vm4, %v2837_v58  ;;  %v1894_v58 = vld [vmem:[%s4251_s9] sm:$0xff] }
 0x3c8   :  { %3284 = vmatprep.mubr.msk.f32.mxu1 %vm1003_vm4, %v2846_v59 }
 0x471   :  { %v3262_v60 = vpop.f32.mrb[12].mxu0 }
 0x472   :  { %v1575_v61 = vmul.f32 2.0, %v3262_v60  ;;  %v1558_v62 = vpop.f32.mrb[13].mxu0 }
 0x473   :  { %v1573_v63 = vmul.f32 2.0, %v1558_v62  ;;  %v3263_v0 = vpop.f32.mrb[14].mxu0 }
 0x474   :  { %v1576_v4 = vmul.f32 2.0, %v3263_v0  ;;  %v1561_v5 = vpop.f32.mrb[15].mxu0  ;;  %v1579_v8 = vsub.f32 %v1575_v61, %v3982_v30 }
 0x475   :  { %v1574_v7 = vmul.f32 2.0, %v1561_v5  ;;  %v1577_v10 = vsub.f32 %v1573_v63, %v3976_v25  ;;  %v2871_v63 = vld [vmem:[%s4251_s9 + $0x18] sm:$0xff] }
 0x476   :  { %v1580_v3 = vsub.f32 %v1576_v4, %v3978_v27 }
 0x477   :  { %v1578_v11 = vsub.f32 %v1574_v7, %v3974_v23 }
 0x478   :  { %v3461_v14 = vpack.c.bf16 %v1580_v3, %v1579_v8 }
 0x479   :  { %v3457_v15 = vpack.c.bf16 %v1578_v11, %v1577_v10 }
 0x47b   :  { %3458 = vmatprep.subr.bf16.mxu1 %v3457_v15 }
 0x47c   :  { %3460 = vmatpush3.bf16.msra.mxu1 %v3457_v15 }
 0x47d   :  { %3462 = vmatprep.subr.bf16.mxu1 %v3461_v14 }
 0x480   :  { %3464 = vmatpush3.bf16.msra.mxu1 %v3461_v14 }
 0x483   :  { %3285 = vmatmul.mubr.msk.f32.vlgmr.msra.gmra.mrb[12].mxu1 %vm1003_vm4, %v2847_v17 }
 0x484   :  { %3287 = vmatprep.mubr.msk.f32.mxu1 %vm1003_vm4, %v2848_v20 }
 0x487   :  { %3288 = vmatmul.mubr.msk.f32.gmra.mrb[14].mxu1 %vm1003_vm4, %v2849_v21 }
 0x488   :  { %3298 = vmatprep.mubr.msk.f32.mxu1 %vm1003_vm4, %v2854_v22 }
 0x48f   :  { %v3274_v24 = vpop.f32.mrb[16].mxu0 }
 0x490   :  { %v1640_v26 = vmul.f32 2.0, %v3274_v24  ;;  %v1623_v28 = vpop.f32.mrb[17].mxu0 }
 0x491   :  { %v1638_v29 = vmul.f32 2.0, %v1623_v28  ;;  %v3275_v31 = vpop.f32.mrb[18].mxu0 }
 0x492   :  { %v1641_v32 = vmul.f32 2.0, %v3275_v31  ;;  %v1626_v33 = vpop.f32.mrb[19].mxu0  ;;  %v1644_v35 = vsub.f32 %v1640_v26, %v3982_v30  ;;  %v2856_v30 = vld [vmem:[%s4249_s7 + $0x50] sm:$0xff]  ;;  %v2883_v31 = vld [vmem:[%s4251_s9 + $0x28] sm:$0xff] }
 0x493   :  { %v1639_v34 = vmul.f32 2.0, %v1626_v33  ;;  %v1642_v37 = vsub.f32 %v1638_v29, %v3976_v25  ;;  %v1896_v25 = vld [vmem:[%s4252_s10] sm:$0xff] }
 0x494   :  { %v1645_v36 = vsub.f32 %v1641_v32, %v3978_v27  ;;  %3312 = vmatprep.mubr.msk.f32.mxu0 %vm1003_vm4, %v1896_v25  ;;  %v1870_v27 = vpop.permute.xlu1 %1869  ;;  %v2886_v32 = vld [vmem:[%s4252_s10 + $0x20] sm:$0xff] }
 0x495   :  { %v1643_v38 = vsub.f32 %v1639_v34, %v3974_v23  ;;  %v2857_v23 = vld [vmem:[%s4249_s7 + $0x58] sm:$0xff] }
 0x496   :  { %v3469_v39 = vpack.c.bf16 %v1645_v36, %v1644_v35 }
 0x497   :  { %v3465_v40 = vpack.c.bf16 %v1643_v38, %v1642_v37 }
 0x498   :  { %v1880_v48 = vpop.permute.xlu1 %1879 }
 0x499   :  { %3466 = vmatprep.subr.bf16.mxu1 %v3465_v40 }
 0x49a   :  { %3468 = vmatpush3.bf16.msra.mxu1 %v3465_v40 }
 0x49b   :  { %3470 = vmatprep.subr.bf16.mxu1 %v3469_v39 }
 0x49e   :  { %3472 = vmatpush3.bf16.msra.mxu1 %v3469_v39 }
 0x49f   :  { %3326 = vmatprep.subr.bf16.mxu1 %v3744_v2 }
 0x4a1   :  { %3299 = vmatmul.mubr.msk.f32.vlgmr.msra.gmra.mrb[12].mxu1 %vm1003_vm4, %v2855_v41 }
 0x4a2   :  { %3301 = vmatprep.mubr.msk.f32.mxu1 %vm1003_vm4, %v2856_v30  ;;  %3327 = vmatpush3.bf16.msra.mxu1 %v3744_v2 }
 0x4a3   :  { %3328 = vmatprep.subr.bf16.mxu1 %v3763_v6 }
 0x4a5   :  { %3302 = vmatmul.mubr.msk.f32.gmra.mrb[14].mxu1 %vm1003_vm4, %v2857_v23 }
 0x4a6   :  { %3329 = vmatpush3.bf16.msra.mxu1 %v3763_v6 }
 0x4a7   :  { %3330 = vmatprep.subr.bf16.mxu1 %v3780_v9 }
 0x4aa   :  { %3331 = vmatpush3.bf16.msra.mxu1 %v3780_v9 }
 0x4ab   :  { %3332 = vmatprep.subr.bf16.mxu1 %v3800_v12 }
 0x4ae   :  { %3333 = vmatpush3.bf16.msra.mxu1 %v3800_v12 }
 0x4af   :  { %3372 = vmatprep.subr.bf16.mxu1 %v3744_v2 }
 0x574   :  { %v3300_v43 = vpop.f32.mrb[12].mxu1 }
 0x575   :  { %v1883_v44 = vadd.f32 %v3300_v43, %v1870_v27  ;;  %v1835_v45 = vpop.f32.mrb[13].mxu1  ;;  %v2887_v43 = vld [vmem:[%s4252_s10 + $0x28] sm:$0xff] }
 0x576   :  { %v1882_v46 = vadd.f32 %v1865_v42, %v1835_v45  ;;  %v2650_v45 = vpop.permute.xlu1 %2649 }
 0x577   :  { %v4130_v47 = vmax.f32 %v1883_v44, 0.0  ;;  %v3646_v44 = vmov 0.0|0.0  }
 0x578   :  { %v4132_v49 = vmax.f32 %v1882_v46, 0.0  ;;  %v3303_v50 = vpop.f32.mrb[14].mxu1 }
 0x579   :  { %v4134_v52 = vadd.f32 %v3303_v50, %v1880_v48  ;;  %v1845_v53 = vpop.f32.mrb[15].mxu1  ;;  %v2645_v48 = vpop.permute.xlu0 %2644 }
 0x57a   :  { %v3473_v54 = vpack.c.bf16 %v4130_v47, %v4132_v49  ;;  %v4138_v55 = vadd.f32 %v1875_v51, %v1845_v53  ;;  %v2661_v53 = vlaneseq }
 0x57c   :  { %v3477_v56 = vpack.c.bf16 %v4134_v52, %v4138_v55  ;;  %3474 = vmatprep.subr.bf16.mxu0 %v3473_v54  ;;  %3334 = vmatprep.mubr.msk.bf16.mxu1 %vm314_vm3, %v3473_v54 }
 0x57d   :  { %3476 = vmatpush3.bf16.msra.mxu0 %v3473_v54 }
 0x57e   :  { %3478 = vmatprep.subr.bf16.mxu0 %v3477_v56  ;;  %3335 = vmatmul.mubr.msk.bf16.vlgmr.msra.gmra.mrb[20].mxu1 %vm314_vm3, %v3477_v56 }
 0x57f   :  { %3373 = vmatpush3.bf16.msra.mxu1 %v3744_v2  ;;  %v1895_v2 = vld [vmem:[%s4251_s9 + $0x8] sm:$0xff] }
 0x580   :  { %3374 = vmatprep.subr.bf16.mxu1 %v3763_v6 }
 0x581   :  { %3480 = vmatpush3.bf16.msra.mxu0 %v3477_v56 }
 0x582   :  { %3482 = vmatprep.subr.bf16.mxu0 %v3473_v54 }
 0x583   :  { %3375 = vmatpush3.bf16.msra.mxu1 %v3763_v6  ;;  %v2870_v6 = vld [vmem:[%s4251_s9 + $0x10] sm:$0xff] }
 0x584   :  { %3313 = vmatmul.mubr.msk.f32.vlgmr.msra.gmra.mrb[20].mxu0 %vm1003_vm4, %v1897_v57  ;;  %3376 = vmatprep.subr.bf16.mxu1 %v3780_v9 }
 0x585   :  { %3484 = vmatpush3.bf16.msra.mxu0 %v3473_v54  ;;  %3323 = vmatprep.mubr.msk.f32.mxu0 %vm1003_vm4, %v1894_v58 }
 0x586   :  { %3486 = vmatprep.subr.bf16.mxu0 %v3477_v56 }
 0x587   :  { %3377 = vmatpush3.bf16.msra.mxu1 %v3780_v9 }
 0x588   :  { %3378 = vmatprep.subr.bf16.mxu1 %v3800_v12 }
 0x589   :  { %3488 = vmatpush3.bf16.msra.mxu0 %v3477_v56 }
 0x58a   :  { %3338 = vmatprep.subr.bf16.mxu0 %v3802_v13 }
 0x58b   :  { %3379 = vmatpush3.bf16.msra.mxu1 %v3800_v12 }
 0x58c   :  { %3324 = vmatmul.mubr.msk.f32.vlgmr.msra.gmra.mrb[20].mxu0 %vm1003_vm4, %v1895_v2  ;;  %3384 = vmatprep.subr.bf16.mxu1 %v3802_v13 }
 0x58d   :  { %3339 = vmatpush3.bf16.msra.mxu0 %v3802_v13  ;;  %3346 = vmatprep.mubr.msk.bf16.mxu0 %vm314_vm3, %v3473_v54  ;;  %v2662_v54 = vshrl.u32 %v2661_v53, 7 }
 0x58e   :  { %3340 = vmatprep.subr.bf16.mxu0 %v3813_v16 }
 0x591   :  { %3341 = vmatpush3.bf16.msra.mxu0 %v3813_v16 }
 0x592   :  { %3342 = vmatprep.subr.bf16.mxu0 %v3825_v18 }
 0x595   :  { %3343 = vmatpush3.bf16.msra.mxu0 %v3825_v18 }
 0x596   :  { %3344 = vmatprep.subr.bf16.mxu0 %v3835_v19 }
 0x599   :  { %3345 = vmatpush3.bf16.msra.mxu0 %v3835_v19 }
 0x59c   :  { %3347 = vmatmul.mubr.msk.bf16.vlgmr.msra.gmra.mrb[24].mxu0 %vm314_vm3, %v3477_v56  ;;  %v2659_v56 = vpop.permute.xlu0 %2658 }
 0x59d   :  { %3358 = vmatprep.mubr.msk.f32.mxu0 %vm1003_vm4, %v2870_v6 }
 0x651   :  { %v3336_v9 = vpop.f32.mrb[20].mxu1 }
 0x652   :  { %v2102_v12 = vpop.f32.mrb[21].mxu1 }
 0x653   :  { %v3337_v59 = vpop.f32.mrb[22].mxu1 }
 0x654   :  { %v3493_v60 = vpack.c.bf16 %v3337_v59, %v3336_v9  ;;  %v2105_v61 = vpop.f32.mrb[23].mxu1 }
 0x655   :  { %v3489_v62 = vpack.c.bf16 %v2105_v61, %v2102_v12 }
 0x657   :  { %3490 = vmatprep.subr.bf16.mxu0 %v3489_v62  ;;  %3380 = vmatprep.mubr.msk.bf16.mxu1 %vm314_vm3, %v3489_v62 }
 0x658   :  { %3492 = vmatpush3.bf16.msra.mxu0 %v3489_v62  ;;  %3381 = vmatmul.mubr.msk.bf16.vlgmr.msra.gmra.mrb[24].mxu1 %vm314_vm3, %v3493_v60 }
 0x659   :  { %3494 = vmatprep.subr.bf16.mxu0 %v3493_v60  ;;  %3385 = vmatpush3.bf16.msra.mxu1 %v3802_v13 }
 0x65a   :  { %3386 = vmatprep.subr.bf16.mxu1 %v3813_v16 }
 0x65c   :  { %3496 = vmatpush3.bf16.msra.mxu0 %v3493_v60 }
 0x65d   :  { %3387 = vmatpush3.bf16.msra.mxu1 %v3813_v16  ;;  %v2874_v16 = vld [vmem:[%s4252_s10 + $0x10] sm:$0xff] }
 0x65e   :  { %3388 = vmatprep.subr.bf16.mxu1 %v3825_v18 }
 0x65f   :  { %3359 = vmatmul.mubr.msk.f32.vlgmr.msra.gmra.mrb[20].mxu0 %vm1003_vm4, %v2871_v63 }
 0x660   :  { %3369 = vmatprep.mubr.msk.f32.mxu0 %vm1003_vm4, %v2874_v16 }
 0x661   :  { %3389 = vmatpush3.bf16.msra.mxu1 %v3825_v18  ;;  %v2875_v18 = vld [vmem:[%s4252_s10 + $0x18] sm:$0xff]  ;;  %s3647_s10 = smov [#allocation6]  }
 0x662   :  { %3390 = vmatprep.subr.bf16.mxu1 %v3835_v19  ;;  %s2747_s0 = sshll.u32 %s3647_s10, 4  ;;  %s2748_s0 = int_to_ptr.vmem [resolvable:$true] %s2747_s0 }
 0x663   :  { %s3614_s3 = scalar_lea.vmem %s2748_s0, 16  ;;  %s3618_s21 = scalar_lea.vmem %s2748_s0, 32 }
 0x664   :  { %p3615_p8 = scmp.ne.s32.totalorder %s2748_s0, %s3614_s3  ;;  %p3619_p9 = scmp.lt.s32.totalorder %s2748_s0, %s2748_s0 }
 0x665   :  { %3391 = vmatpush3.bf16.msra.mxu1 %v3835_v19  ;;  %v2882_v19 = vld [vmem:[%s4251_s9 + $0x20] sm:$0xff]  ;;  %p3620_p10 = scmp.lt.s32.totalorder %s3618_s21, %s3614_s3 }
 0x666   :  { %3521 = vmatprep.subr.bf16.mxu1 %v3646_v44 }
 0x667   :  { %p3621_p11 = por %p3620_p10, %p3619_p9 }
 0x669   :  { %p3622_p12 = pnand %p3621_p11, %p3615_p8 }
 0x66f   :  { %v3348_v13 = vpop.f32.mrb[24].mxu0 }
 0x670   :  { %v2151_v0 = vpop.f32.mrb[25].mxu0 }
 0x671   :  { %v3349_v4 = vpop.f32.mrb[26].mxu0 }
 0x672   :  { %v3501_v5 = vpack.c.bf16 %v3349_v4, %v3348_v13  ;;  %v2154_v7 = vpop.f32.mrb[27].mxu0 }
 0x673   :  { %v3497_v8 = vpack.c.bf16 %v2154_v7, %v2151_v0 }
 0x675   :  { %3498 = vmatprep.subr.bf16.mxu0 %v3497_v8  ;;  %3392 = vmatprep.mubr.msk.bf16.mxu1 %vm314_vm3, %v3497_v8 }
 0x676   :  { %3500 = vmatpush3.bf16.msra.mxu0 %v3497_v8  ;;  %3393 = vmatmul.mubr.msk.bf16.vlgmr.msra.gmra.mrb[28].mxu1 %vm314_vm3, %v3501_v5 }
 0x677   :  { %3502 = vmatprep.subr.bf16.mxu0 %v3501_v5  ;;  %3422 = vmatprep.mubr.msk.f32.mxu1 %vm3644_vm0, %v3643_v1 }
 0x67a   :  { %3504 = vmatpush3.bf16.msra.mxu0 %v3501_v5 }
 0x67d   :  { %3370 = vmatmul.mubr.msk.f32.vlgmr.msra.gmra.mrb[20].mxu0 %vm1003_vm4, %v2875_v18 }
 0x67e   :  { %3404 = vmatprep.mubr.msk.f32.mxu0 %vm1003_vm4, %v2882_v19 }
 0x72b   :  { %v3382_v1 = vpop.f32.mrb[24].mxu1 }
 0x72c   :  { %v2397_v3 = vmul.f32 2.0, %v3382_v1  ;;  %v2380_v10 = vpop.f32.mrb[25].mxu1 }
 0x72d   :  { %v2395_v11 = vmul.f32 2.0, %v2380_v10  ;;  %v3383_v14 = vpop.f32.mrb[26].mxu1 }
 0x72e   :  { %v2398_v15 = vmul.f32 2.0, %v3383_v14  ;;  %v2383_v17 = vpop.f32.mrb[27].mxu1  ;;  %v2401_v21 = vsub.f32 %v2397_v3, %v4138_v55 }
 0x72f   :  { %v2396_v20 = vmul.f32 2.0, %v2383_v17  ;;  %v2399_v24 = vsub.f32 %v2395_v11, %v4132_v49 }
 0x730   :  { %v2402_v22 = vsub.f32 %v2398_v15, %v4134_v52 }
 0x731   :  { %v2400_v26 = vsub.f32 %v2396_v20, %v4130_v47 }
 0x732   :  { %v3509_v28 = vpack.c.bf16 %v2402_v22, %v2401_v21 }
 0x733   :  { %v3505_v29 = vpack.c.bf16 %v2400_v26, %v2399_v24 }
 0x735   :  { %3506 = vmatprep.subr.bf16.mxu0 %v3505_v29 }
 0x736   :  { %3508 = vmatpush3.bf16.msra.mxu0 %v3505_v29 }
 0x737   :  { %3510 = vmatprep.subr.bf16.mxu0 %v3509_v28 }
 0x73a   :  { %3512 = vmatpush3.bf16.msra.mxu0 %v3509_v28 }
 0x73d   :  { %3405 = vmatmul.mubr.msk.f32.vlgmr.msra.gmra.mrb[20].mxu0 %vm1003_vm4, %v2883_v31 }
 0x73e   :  { %3415 = vmatprep.mubr.msk.f32.mxu0 %vm1003_vm4, %v2886_v32 }
 0x749   :  { %v3394_v33 = vpop.f32.mrb[28].mxu1 }
 0x74a   :  { %v2462_v34 = vmul.f32 2.0, %v3394_v33  ;;  %v2445_v35 = vpop.f32.mrb[29].mxu1 }
 0x74b   :  { %v2460_v36 = vmul.f32 2.0, %v2445_v35  ;;  %v3395_v37 = vpop.f32.mrb[30].mxu1 }
 0x74c   :  { %v2463_v38 = vmul.f32 2.0, %v3395_v37  ;;  %v2448_v39 = vpop.f32.mrb[31].mxu1  ;;  %v2466_v41 = vsub.f32 %v2462_v34, %v4138_v55  ;;  %v2663_v55 = vsub.s32 0, %v2662_v54 }
 0x74d   :  { %v2461_v40 = vmul.f32 2.0, %v2448_v39  ;;  %v2464_v23 = vsub.f32 %v2460_v36, %v4132_v49 }
 0x74e   :  { %v2467_v30 = vsub.f32 %v2463_v38, %v4134_v52  ;;  %v2654_v52 = vld [vmem:[%s4254_s12] sm:$0x1]  ;;  %v2664_v57 = vrot.slane %v2659_v56, %v2663_v55 }
 0x74f   :  { %v2465_v25 = vsub.f32 %v2461_v40, %v4130_v47 }
 0x750   :  { %v3517_v27 = vpack.c.bf16 %v2467_v30, %v2466_v41 }
 0x751   :  { %v3513_v42 = vpack.c.bf16 %v2465_v25, %v2464_v23 }
 0x753   :  { %3514 = vmatprep.subr.bf16.mxu0 %v3513_v42 }
 0x754   :  { %3516 = vmatpush3.bf16.msra.mxu0 %v3513_v42 }
 0x755   :  { %3518 = vmatprep.subr.bf16.mxu0 %v3517_v27 }
 0x758   :  { %3520 = vmatpush3.bf16.msra.mxu0 %v3517_v27 }
 0x75b   :  { %3416 = vmatmul.mubr.msk.f32.vlgmr.msra.gmra.mrb[20].mxu0 %vm1003_vm4, %v2887_v43 }
 0x82e   :  { %v3417_v46 = vpop.f32.mrb[20].mxu0 }
 0x82f   :  { %v2653_v49 = vadd.f32 %v3417_v46, %v2650_v45  ;;  %v2629_v50 = vpop.f32.mrb[21].mxu0 }
 0x830   :  { %v2652_v47 = vadd.f32 %v2645_v48, %v2629_v50 }
 0x832   :  { %v3522_v51 = vpack.c.bf16 %v2653_v49, %v2652_v47 }
 0x834   :  { %3523 = vmatpush3.bf16.msra.mxu1 %v3522_v51 }
 0x837   :  { %3423 = vmatmul.mubr.msk.f32.vlgmr.msra.gmra.mrb[32].mxu1 %vm2665_vm5, %v2654_v52 }
 0x90a   :  { %v2735_v58 = vpop.f32.mrb[32].mxu1 }
 0x90b   :  { %v2736_v2 = vadd.f32 %v2735_v58, %v2664_v57  ;;  %v3424_v6 = vpop.f32.mrb[33].mxu1 }
 0x90d   :  { %2740 = vst.msk [vmem:[#allocation6] sm:$0x1] %vm2739_vm6, %v2736_v2 }
 0x90e   :  { %3625 = shalt.err (!%p3622_p12)
}
 0x90f   :  { %s3626_s22 = scalar_lea.hbm %s4256_s14, 16 }
 0x910   :  { %p3627_p13 = scmp.ne.s32.totalorder %s4256_s14, %s3626_s22  ;;  %p3630_p0 = scmp.lt.u32.totalorder %s3626_s22, %s4256_s14 }
 0x912   :  { %p3632_p1 = pnand %p3630_p0, %p3627_p13 }
 0x914   :  { %3635 = shalt.err (!%p3632_p1)
}
 0x915   :  { %2750 = dma.vmem_to_hbm [thread:$0]  %s2748_s0, 16, %s4256_s14, [#allocation5]  }
 0x916   :  { %3638 = dma.done.wait [#allocation5], 16  }
 0x917   :  { %3639 = vsyncadd [#allocation5], 4294967280 }
 0x918   :  { %2754 = vsyncpa [#allocation4], 1 }
 0x919   :  { %2755 = vsyncpa [#allocation5], 1 }

</bundles_post_ra>
